<compile_context>
chip_gen: v5e
topology: v5e:2x2
jax: 0.10.0
libtpu: 0.0.40
codegen_flags: <defaults>
</compile_context>

<pallas_src>
import jax
import jax.numpy as jnp
from jax.experimental import pallas as pl
from jax.experimental.pallas import tpu as pltpu


def greater_than_onehot_kernel(obs_ref, var_ref, out_ref):
    # obs_ref: (S, TB)  var_ref: (S, 1)  out_ref: (2, S, TB)   -- batch on lanes
    gt = (obs_ref[...] > var_ref[...]).astype(jnp.float32)   # (S, TB)
    out_ref[0, :, :] = 1.0 - gt                               # class 0: a <= b
    out_ref[1, :, :] = gt                                     # class 1: a >  b


def _pick_batch_tile(batch):
    """Largest clean lane-dense tile; fall back to a single full block."""
    for tb in (512, 1024, 2048, 256, 128):   # prefer ~512 lanes (roofline-friendly)
        if batch % tb == 0:
            return tb
    return batch  # small / odd batch: single block equal to full array dims


def cartpole_policies_forward_planes(obs_sb, variables):
    """Core kernel entry.

    obs_sb:    (obs_size, batch) f32  -- observations already transposed
    variables: (obs_size,)       f32
    returns    (2, obs_size, batch) f32, plane 0 = (obs <= var), plane 1 = (obs > var)
    """
    obs_size, batch = obs_sb.shape
    var2d = variables.reshape(obs_size, 1)

    tb = _pick_batch_tile(batch)
    num_tiles = batch // tb

    cost = pl.CostEstimate(
        flops=2 * obs_size * batch,          # compare + subtract
        transcendentals=0,
        bytes_accessed=4 * obs_size * batch  # obs read
        + 4 * obs_size                       # variables read
        + 8 * obs_size * batch,              # two f32 output planes written
    )

    return pl.pallas_call(
        greater_than_onehot_kernel,
        out_shape=jax.ShapeDtypeStruct((2, obs_size, batch), jnp.float32),
        grid=(num_tiles,),
        in_specs=[
            pl.BlockSpec((obs_size, tb), lambda i: (0, i)),
            pl.BlockSpec((obs_size, 1), lambda i: (0, 0)),
        ],
        out_specs=pl.BlockSpec((2, obs_size, tb), lambda i: (0, 0, i)),
        compiler_params=pltpu.CompilerParams(
            dimension_semantics=("parallel",),
        ),
        cost_estimate=cost,
    )(obs_sb, var2d)


def cartpole_policies_forward(observations, variables):
    """PyTorch-parity wrapper.

    observations: (batch, obs_size) f32; variables: (obs_size,) f32
    returns       (obs_size, batch, 2) f32, matching the nn.Module output.

    The transpose and final axis-move are XLA glue outside the kernel; for
    large RL batches prefer calling `cartpole_policies_forward_planes` with a
    pre-transposed (obs_size, batch) slab and consuming the (2, S, B) layout.
    """
    planes = cartpole_policies_forward_planes(observations.T, variables)
    return jnp.moveaxis(planes, 0, -1)


def _reference(observations, variables):
    gt = (observations.T > variables.reshape(-1, 1)).astype(jnp.float32)  # (S, B)
    return jnp.stack([1.0 - gt, gt], axis=-1)                             # (S, B, 2)


if __name__ == "__main__":
    # TODO(synk): only the forward pass is implemented; GreaterThanFn's custom
    # straight-through backward would need a jax.custom_vjp wrapper.
    key = jax.random.PRNGKey(0)

    # CartPole-sized example: obs_size=4, batch=8 (single-block path).
    batch, obs_size = 8, 4
    observations = jax.random.normal(key, (batch, obs_size), dtype=jnp.float32)
    variables = jnp.zeros((obs_size,), dtype=jnp.float32)  # nn.Parameter(zeros)

    out = jax.block_until_ready(cartpole_policies_forward(observations, variables))
    ref = _reference(observations, variables)
    assert out.shape == (obs_size, batch, 2), out.shape
    assert out.dtype == jnp.float32
    assert jnp.allclose(out, ref), "mismatch vs reference (small batch)"

    # Larger batch exercising the tiled / parallel-grid path (1024 = 2 x 512 tiles).
    batch2 = 1024
    obs2 = jax.random.normal(jax.random.PRNGKey(1), (batch2, obs_size),
                             dtype=jnp.float32)
    var2 = jax.random.normal(jax.random.PRNGKey(2), (obs_size,),
                             dtype=jnp.float32)
    out2 = jax.block_until_ready(cartpole_policies_forward(obs2, var2))
    ref2 = _reference(obs2, var2)
    assert out2.shape == (obs_size, batch2, 2)
    assert jnp.allclose(out2, ref2), "mismatch vs reference (tiled batch)"

    print("KERNEL_OK")
</pallas_src>

<mosaic_0001>
module attributes {stable_mosaic.version = 11 : i64} {
  func.func @greater_than_onehot_kernel(%arg0: i32, %arg1: memref<4x8xf32, #tpu.memory_space<vmem>>, %arg2: memref<4x1xf32, #tpu.memory_space<vmem>>, %arg3: memref<2x4x8xf32, #tpu.memory_space<vmem>>) attributes {dimension_semantics = [#tpu.dimension_semantics<parallel>], iteration_bounds = array<i64: 1>, scalar_prefetch = 0 : i64, scratch_operands = 0 : i64, tpu.core_type = #tpu.core_type<tc>, window_params = [{transform_indices = @transform_0, window_bounds = array<i64: 4, 8>}, {pipeline_mode = #tpu.pipeline_mode<synchronous>, transform_indices = @transform_1, window_bounds = array<i64: 4, 1>}, {transform_indices = @transform_2, window_bounds = array<i64: 2, 4, 8>}]} {
    %c0 = arith.constant 0 : index
    %c0_0 = arith.constant 0 : index
    %0 = vector.load %arg1[%c0, %c0_0] : memref<4x8xf32, #tpu.memory_space<vmem>>, vector<4x8xf32>
    %c0_1 = arith.constant 0 : index
    %c0_2 = arith.constant 0 : index
    %1 = vector.load %arg2[%c0_1, %c0_2] : memref<4x1xf32, #tpu.memory_space<vmem>>, vector<4x1xf32>
    %2 = vector.broadcast %1 : vector<4x1xf32> to vector<4x8xf32>
    %3 = arith.cmpf ogt, %0, %2 : vector<4x8xf32>
    %4 = arith.extui %3 : vector<4x8xi1> to vector<4x8xi32>
    %5 = arith.sitofp %4 : vector<4x8xi32> to vector<4x8xf32>
    %cst = arith.constant 1.000000e+00 : f32
    %6 = vector.broadcast %cst : f32 to vector<4x8xf32>
    %7 = arith.subf %6, %5 : vector<4x8xf32>
    %c0_3 = arith.constant 0 : index
    %c0_4 = arith.constant 0 : index
    %c0_5 = arith.constant 0 : index
    %8 = vector.load %arg3[%c0_3, %c0_4, %c0_5] : memref<2x4x8xf32, #tpu.memory_space<vmem>>, vector<1x4x8xf32>
    %9 = vector.shape_cast %8 : vector<1x4x8xf32> to vector<4x8xf32>
    %10 = vector.shape_cast %7 : vector<4x8xf32> to vector<1x4x8xf32>
    tpu.vector_store %arg3[%c0_3, %c0_4, %c0_5], %10 {strides = array<i32>} : memref<2x4x8xf32, #tpu.memory_space<vmem>>, vector<1x4x8xf32>,
    %c1 = arith.constant 1 : index
    %c0_6 = arith.constant 0 : index
    %c0_7 = arith.constant 0 : index
    %11 = vector.load %arg3[%c1, %c0_6, %c0_7] : memref<2x4x8xf32, #tpu.memory_space<vmem>>, vector<1x4x8xf32>
    %12 = vector.shape_cast %11 : vector<1x4x8xf32> to vector<4x8xf32>
    %13 = vector.shape_cast %5 : vector<4x8xf32> to vector<1x4x8xf32>
    tpu.vector_store %arg3[%c1, %c0_6, %c0_7], %13 {strides = array<i32>} : memref<2x4x8xf32, #tpu.memory_space<vmem>>, vector<1x4x8xf32>,
    return
  }
  func.func @transform_0(%arg0: i32) -> (i32, i32) {
    %c0_i32 = arith.constant 0 : i32
    %c0_i32_0 = arith.constant 0 : i32
    return %c0_i32, %arg0 : i32, i32
  }
  func.func @transform_1(%arg0: i32) -> (i32, i32) {
    %c0_i32 = arith.constant 0 : i32
    %c0_i32_0 = arith.constant 0 : i32
    %c0_i32_1 = arith.constant 0 : i32
    return %c0_i32, %c0_i32_0 : i32, i32
  }
  func.func @transform_2(%arg0: i32) -> (i32, i32, i32) {
    %c0_i32 = arith.constant 0 : i32
    %c0_i32_0 = arith.constant 0 : i32
    %c0_i32_1 = arith.constant 0 : i32
    return %c0_i32, %c0_i32_0, %arg0 : i32, i32, i32
  }
}

</mosaic_0001>

<bundles_post_ra>
// kernel: tpu_custom_call.1
= control target key start
LH: loop header
LB: loop body
LE: loop exit
PB: predicated region body
PF: predicated region fallthrough
CT: control target
= control target key end

     0   :  { %v78_v1 = vmov 0   ;;  %s107_s0 = inlined_call_operand.vmem [shape: f32[4,8], index: 0, kind: input, shape index: {}]   ;;  %s108_s1 = inlined_call_operand.vmem [shape: f32[4,1], index: 1, kind: input, shape index: {}]   ;;  %s109_s2 = inlined_call_operand.hbm [shape: f32[2,4,8], index: 2, kind: output, shape index: {}]  }
   0x1   :  { %v13_v0 = vld [vmem:[%s108_s1] sm:$0xf]  ;;  %51 = vset.pattern.permute.xlu0 %v78_v1 }
   0x2   :  { %7 = vsyncpa [#allocation3], 0  ;;  %16 = vperm.xlu0 %51, %v13_v0   ;;  %v12_v2 = vld [vmem:[%s107_s0] sm:$0xf]  ;;  %s79_s13 = smov [#allocation2]   ;;  %s33_s17 = sshll.u32 %s109_s2, 4  ;;  %s34_s17 = int_to_ptr.hbm [resolvable:$true] %s33_s17 }
   0x3   :  { %s31_s14 = sshll.u32 %s79_s13, 4  ;;  %vm23_vm0 = vcmask 60416   ;;  %v80_v4 = vmov 0.0   ;;  %s81_s1 = smov 64   ;;  %s32_s14 = int_to_ptr.vmem [resolvable:$true] %s31_s14 }
   0x4   :  { %s82_s18 = smov 4  }
  0x74   :  { %v17_v3 = vpop.permute.xlu0 %16 }
  0x75   :  { %vm19_vm1 = vcmp.gt.f32.partialorder %v12_v2, %v17_v3 }
  0x76   :  { %v45_v5 = vsel %vm19_vm1, 1.0, %v80_v4 }
  0x77   :  { %v22_v6 = vsub.f32 1.0, %v45_v5  ;;  %26 = vst.msk [vmem:[#allocation2 + $0x4] sm:$0xf] %vm23_vm0, %v45_v5 }
  0x79   :  { %24 = vst.msk [vmem:[#allocation2] sm:$0xf] %vm23_vm0, %v22_v6 }
  0x7a   :  { %39 = dma.vmem_to_hbm [thread:$0]  %s32_s14, 128, %s34_s17, [#allocation3], %s81_s1, %s81_s1, %s82_s18  }
  0x7b   :  { %76 = dma.done.wait [#allocation3], 128  }
  0x7c   :  { %77 = vsyncadd [#allocation3], 4294967168 }
  0x7d   :  { %44 = vsyncpa [#allocation3], 1 }

</bundles_post_ra>
